<compile_context>
chip_gen: v6e
topology: v6e:2x2x1
jax: 0.10.0
libtpu: 0.0.40
codegen_flags: <defaults>
</compile_context>

<pallas_src>
import jax
import jax.numpy as jnp
from jax.experimental import pallas as pl
from jax.experimental.pallas import tpu as pltpu


def _round_up(v, m):
    return ((v + m - 1) // m) * m


def _cdiv(a, b):
    return (a + b - 1) // b


def _pad2(a, rows, cols):
    pr = rows - a.shape[0]
    pc = cols - a.shape[1]
    if pr or pc:
        a = jnp.pad(a, ((0, pr), (0, pc)))
    return a


# ---------------- kernels (matmul + bias [+ relu + matmul + bias] fused) -------

def _fc_expand_kernel(x_ref, w1_ref, b1_ref, w2_ref, b2_ref, o_ref):
    # cast x to the MXU compute dtype in-kernel (VPU op, hidden under DMA/MXU)
    x = x_ref[...].astype(w1_ref.dtype)
    # (TB, Kp) @ (Kp, Ep) -> f32 accumulate on the MXU
    h = jnp.dot(x, w1_ref[...], preferred_element_type=jnp.float32)
    # bias + ReLU in f32 on the VPU (v5e has no bf16 VALU)
    h = jnp.maximum(h + b1_ref[...], 0.0)
    # second matmul: downcast activations to the compute dtype for the MXU
    y = jnp.dot(h.astype(w2_ref.dtype), w2_ref[...],
                preferred_element_type=jnp.float32)
    # store directly in the caller's dtype (lane-dense, no post-kernel cast pass)
    o_ref[...] = (y + b2_ref[...]).astype(o_ref.dtype)


def _fc_plain_kernel(x_ref, w_ref, b_ref, o_ref):
    x = x_ref[...].astype(w_ref.dtype)
    y = jnp.dot(x, w_ref[...], preferred_element_type=jnp.float32)
    o_ref[...] = (y + b_ref[...]).astype(o_ref.dtype)


# ---------------- wrapper ------------------------------------------------------

class FCPallas:
    """JAX/Pallas equivalent of the torch FC module (forward only).

    Weights are stored pre-transposed as (in_features, out_features), zero-padded
    to 128-lane multiples once at init, and downcast to `compute_dtype` (bf16 by
    default). Biases and MXU accumulation stay f32.
    """

    def __init__(self, input_dim, output_dim, expand_dim, key,
                 compute_dtype=jnp.bfloat16):
        self.input_dim = int(input_dim)
        self.output_dim = int(output_dim)
        self.expand_dim = int(expand_dim)
        self.compute_dtype = compute_dtype

        self.k_pad = _round_up(self.input_dim, 128)
        self.n_pad = _round_up(self.output_dim, 128)

        if self.expand_dim > 0:
            self.e_pad = _round_up(self.expand_dim, 128)
            k1, k2, k3, k4 = jax.random.split(key, 4)
            # torch.nn.Linear default init: U(-1/sqrt(fan_in), 1/sqrt(fan_in))
            bnd1 = 1.0 / float(self.input_dim) ** 0.5
            bnd2 = 1.0 / float(self.expand_dim) ** 0.5
            self.w1 = jax.random.uniform(k1, (self.input_dim, self.expand_dim),
                                         jnp.float32, -bnd1, bnd1)
            self.b1 = jax.random.uniform(k2, (1, self.expand_dim),
                                         jnp.float32, -bnd1, bnd1)
            self.w2 = jax.random.uniform(k3, (self.expand_dim, self.output_dim),
                                         jnp.float32, -bnd2, bnd2)
            self.b2 = jax.random.uniform(k4, (1, self.output_dim),
                                         jnp.float32, -bnd2, bnd2)
            # padded, compute-dtype copies used by the kernel (zero padding is
            # mathematically inert: padded x cols hit padded w1 rows, padded
            # hidden cols hit zero w2 rows, padded out cols are sliced off)
            self.w1_p = _pad2(self.w1, self.k_pad, self.e_pad).astype(compute_dtype)
            self.b1_p = _pad2(self.b1, 1, self.e_pad)                      # f32
            self.w2_p = _pad2(self.w2, self.e_pad, self.n_pad).astype(compute_dtype)
            self.b2_p = _pad2(self.b2, 1, self.n_pad)                      # f32
        else:
            self.e_pad = 0
            k1, k2 = jax.random.split(key, 2)
            bnd = 1.0 / float(self.input_dim) ** 0.5
            self.w2 = jax.random.uniform(k1, (self.input_dim, self.output_dim),
                                         jnp.float32, -bnd, bnd)
            self.b2 = jax.random.uniform(k2, (1, self.output_dim),
                                         jnp.float32, -bnd, bnd)
            self.w2_p = _pad2(self.w2, self.k_pad, self.n_pad).astype(compute_dtype)
            self.b2_p = _pad2(self.b2, 1, self.n_pad)                      # f32

    # ---- batch tile selection -------------------------------------------------
    @staticmethod
    def _pick_batch_tile(B):
        # >=2 grid steps whenever B >= 256 so ("parallel",) shards across both
        # v7x TensorCores; cap at 1024 rows (amortizes ~0.35us/step pipeline
        # overhead on v5e/v6e while staying well inside v7x's 64 MiB VMEM).
        if B >= 2048:
            return 1024
        if B >= 256:
            return min(1024, _round_up(_cdiv(B, 2), 16))
        return _round_up(max(B, 1), 16)

    # ---- VMEM budget (double-buffered streamed tiles + resident weights) -----
    def _vmem_limit_bytes(self, TB, x_itemsize, out_itemsize):
        cdt = jnp.dtype(self.compute_dtype).itemsize
        est = 2 * TB * self.k_pad * x_itemsize       # x tiles (original dtype)
        est += 2 * TB * self.n_pad * out_itemsize    # out tiles (caller dtype)
        if self.expand_dim > 0:
            est += 2 * (self.k_pad * self.e_pad * cdt + self.e_pad * 4
                        + self.e_pad * self.n_pad * cdt + self.n_pad * 4)
            est += TB * self.e_pad * (4 + cdt)       # hidden f32 + bf16 intermediates
        else:
            est += 2 * (self.k_pad * self.n_pad * cdt + self.n_pad * 4)
        est += TB * self.n_pad * 4                   # f32 accumulator before store cast
        # generous headroom, capped at v7x's 64 MiB-per-TC physical VMEM
        # (v5e / v6e have 128 MiB and easily fit these shapes)
        return int(min(max(2 * est, 24 << 20), 60 << 20))

    def _cost_estimate(self, B, x_itemsize, out_itemsize):
        cdt = jnp.dtype(self.compute_dtype).itemsize
        if self.expand_dim > 0:
            flops = 2 * B * (self.input_dim * self.expand_dim
                             + self.expand_dim * self.output_dim)
            w_bytes = (self.w1_p.size + self.w2_p.size) * cdt \
                + (self.b1_p.size + self.b2_p.size) * 4
        else:
            flops = 2 * B * self.input_dim * self.output_dim
            w_bytes = self.w2_p.size * cdt + self.b2_p.size * 4
        bytes_accessed = (B * self.k_pad * x_itemsize
                          + B * self.n_pad * out_itemsize + w_bytes)
        return pl.CostEstimate(flops=int(flops), transcendentals=0,
                               bytes_accessed=int(bytes_accessed))

    def __call__(self, x):
        lead = x.shape[:-1]
        K = x.shape[-1]
        assert K == self.input_dim, "feature dim mismatch"
        x2 = x.reshape(-1, K)
        B = x2.shape[0]
        out_dtype = x.dtype

        TB = self._pick_batch_tile(B)
        grid = (_cdiv(B, TB),)

        # Only K lane padding (usually a no-op for CUB feature dims which are
        # multiples of 128). No batch-row padding: the last grid block may be
        # partial; its garbage input rows only produce output rows that Pallas
        # masks on store, and nothing in the kernel reduces over rows.
        if K != self.k_pad:
            x2 = jnp.pad(x2, ((0, 0), (0, self.k_pad - K)))
        # NOTE: no .astype here -- the dtype cast happens inside the kernel.

        x_itemsize = jnp.dtype(x2.dtype).itemsize
        out_itemsize = jnp.dtype(out_dtype).itemsize

        out_shape = jax.ShapeDtypeStruct((B, self.n_pad), out_dtype)
        x_spec = pl.BlockSpec((TB, self.k_pad), lambda i: (i, 0))
        out_spec = pl.BlockSpec((TB, self.n_pad), lambda i: (i, 0))

        def resident(shape):
            # constant index_map -> weights/biases stay VMEM-resident across the grid
            # TODO(synk): single-buffer these via pipeline_mode=pl.Buffered(1) to save
            #             VMEM on v7x once that path is exercised/stable everywhere.
            return pl.BlockSpec(shape, lambda i: (0, 0))

        cparams = pltpu.CompilerParams(
            dimension_semantics=("parallel",),   # shard batch tiles across TCs
            vmem_limit_bytes=self._vmem_limit_bytes(TB, x_itemsize, out_itemsize),
        )
        cost = self._cost_estimate(B, x_itemsize, out_itemsize)

        if self.expand_dim > 0:
            y_p = pl.pallas_call(
                _fc_expand_kernel,
                out_shape=out_shape,
                grid=grid,
                in_specs=[x_spec,
                          resident((self.k_pad, self.e_pad)),
                          resident((1, self.e_pad)),
                          resident((self.e_pad, self.n_pad)),
                          resident((1, self.n_pad))],
                out_specs=out_spec,
                compiler_params=cparams,
                cost_estimate=cost,
            )(x2, self.w1_p, self.b1_p, self.w2_p, self.b2_p)
        else:
            y_p = pl.pallas_call(
                _fc_plain_kernel,
                out_shape=out_shape,
                grid=grid,
                in_specs=[x_spec,
                          resident((self.k_pad, self.n_pad)),
                          resident((1, self.n_pad))],
                out_specs=out_spec,
                compiler_params=cparams,
                cost_estimate=cost,
            )(x2, self.w2_p, self.b2_p)

        # slice off only the lane padding (no row padding, output already in x.dtype)
        y = y_p if self.n_pad == self.output_dim else y_p[:, :self.output_dim]
        return y.reshape(*lead, self.output_dim)


# ---------------- reference (pure JAX, f32 weights) -----------------------------

def _fc_ref(module, x):
    if module.expand_dim > 0:
        h = jnp.maximum(x @ module.w1 + module.b1, 0.0)
        return h @ module.w2 + module.b2
    return x @ module.w2 + module.b2


if __name__ == "__main__":
    key = jax.random.PRNGKey(0)
    kx, kp1, kp2, kx2 = jax.random.split(key, 4)

    batch, input_dim, expand_dim, output_dim = 8, 32, 16, 8
    x = jax.random.normal(kx, (batch, input_dim), jnp.float32)

    # expanded variant (expand_dim > 0): Linear -> ReLU -> Linear
    fc_expand = FCPallas(input_dim, output_dim, expand_dim, kp1)
    y_expand = jax.block_until_ready(fc_expand(x))
    assert y_expand.shape == (batch, output_dim)
    # bf16 MXU operands -> looser tolerance vs the f32 reference
    assert jnp.allclose(y_expand, _fc_ref(fc_expand, x), atol=5e-2, rtol=5e-2), \
        "expand path mismatch"

    # plain variant (expand_dim == 0): single Linear
    fc_plain = FCPallas(input_dim, output_dim, 0, kp2)
    y_plain = jax.block_until_ready(fc_plain(x))
    assert y_plain.shape == (batch, output_dim)
    assert jnp.allclose(y_plain, _fc_ref(fc_plain, x), atol=5e-2, rtol=5e-2), \
        "plain path mismatch"

    # multi-tile grid (>=2 steps) + partial last batch block (300 % TB != 0)
    x_big = jax.random.normal(kx2, (300, input_dim), jnp.float32)
    y_big = jax.block_until_ready(fc_expand(x_big))
    assert y_big.shape == (300, output_dim)
    assert jnp.allclose(y_big, _fc_ref(fc_expand, x_big), atol=5e-2, rtol=5e-2), \
        "partial-block path mismatch"

    print("KERNEL_OK")
</pallas_src>

<mosaic_0001>
module attributes {stable_mosaic.version = 11 : i64} {
  func.func @_fc_expand_kernel(%arg0: i32, %arg1: memref<16x128xf32, #tpu.memory_space<vmem>>, %arg2: memref<128x128xbf16, #tpu.memory_space<vmem>>, %arg3: memref<1x128xf32, #tpu.memory_space<vmem>>, %arg4: memref<128x128xbf16, #tpu.memory_space<vmem>>, %arg5: memref<1x128xf32, #tpu.memory_space<vmem>>, %arg6: memref<16x128xf32, #tpu.memory_space<vmem>>) attributes {dimension_semantics = [#tpu.dimension_semantics<parallel>], iteration_bounds = array<i64: 1>, scalar_prefetch = 0 : i64, scratch_operands = 0 : i64, tpu.core_type = #tpu.core_type<tc>, window_params = [{transform_indices = @transform_0, window_bounds = array<i64: 16, 128>}, {pipeline_mode = #tpu.pipeline_mode<synchronous>, transform_indices = @transform_1, window_bounds = array<i64: 128, 128>}, {pipeline_mode = #tpu.pipeline_mode<synchronous>, transform_indices = @transform_2, window_bounds = array<i64: 1, 128>}, {pipeline_mode = #tpu.pipeline_mode<synchronous>, transform_indices = @transform_3, window_bounds = array<i64: 128, 128>}, {pipeline_mode = #tpu.pipeline_mode<synchronous>, transform_indices = @transform_4, window_bounds = array<i64: 1, 128>}, {transform_indices = @transform_5, window_bounds = array<i64: 16, 128>}]} {
    %c0 = arith.constant 0 : index
    %c0_0 = arith.constant 0 : index
    %0 = vector.load %arg1[%c0, %c0_0] : memref<16x128xf32, #tpu.memory_space<vmem>>, vector<16x128xf32>
    %1 = arith.truncf %0 : vector<16x128xf32> to vector<16x128xbf16>
    %c0_1 = arith.constant 0 : index
    %c0_2 = arith.constant 0 : index
    %2 = vector.load %arg2[%c0_1, %c0_2] : memref<128x128xbf16, #tpu.memory_space<vmem>>, vector<128x128xbf16>
    %cst = arith.constant dense<0.000000e+00> : vector<16x128xf32>
    %3 = tpu.matmul %1, %2, %cst {dimension_numbers = #tpu.dot_dimension_numbers<[1], [0], [0], [1], [0, 0, 1, 1], [], []>} : vector<16x128xbf16>, vector<128x128xbf16>, vector<16x128xf32> -> vector<16x128xf32>
    %c0_3 = arith.constant 0 : index
    %c0_4 = arith.constant 0 : index
    %4 = vector.load %arg3[%c0_3, %c0_4] : memref<1x128xf32, #tpu.memory_space<vmem>>, vector<1x128xf32>
    %5 = vector.broadcast %4 : vector<1x128xf32> to vector<16x128xf32>
    %6 = arith.addf %3, %5 : vector<16x128xf32>
    %cst_5 = arith.constant 0.000000e+00 : f32
    %7 = vector.broadcast %cst_5 : f32 to vector<16x128xf32>
    %8 = arith.maximumf %6, %7 : vector<16x128xf32>
    %9 = arith.truncf %8 : vector<16x128xf32> to vector<16x128xbf16>
    %c0_6 = arith.constant 0 : index
    %c0_7 = arith.constant 0 : index
    %10 = vector.load %arg4[%c0_6, %c0_7] : memref<128x128xbf16, #tpu.memory_space<vmem>>, vector<128x128xbf16>
    %cst_8 = arith.constant dense<0.000000e+00> : vector<16x128xf32>
    %11 = tpu.matmul %9, %10, %cst_8 {dimension_numbers = #tpu.dot_dimension_numbers<[1], [0], [0], [1], [0, 0, 1, 1], [], []>} : vector<16x128xbf16>, vector<128x128xbf16>, vector<16x128xf32> -> vector<16x128xf32>
    %c0_9 = arith.constant 0 : index
    %c0_10 = arith.constant 0 : index
    %12 = vector.load %arg5[%c0_9, %c0_10] : memref<1x128xf32, #tpu.memory_space<vmem>>, vector<1x128xf32>
    %13 = vector.broadcast %12 : vector<1x128xf32> to vector<16x128xf32>
    %14 = arith.addf %11, %13 : vector<16x128xf32>
    %c0_11 = arith.constant 0 : index
    %c0_12 = arith.constant 0 : index
    %15 = vector.load %arg6[%c0_11, %c0_12] : memref<16x128xf32, #tpu.memory_space<vmem>>, vector<16x128xf32>
    tpu.vector_store %arg6[%c0_11, %c0_12], %14 {strides = array<i32>} : memref<16x128xf32, #tpu.memory_space<vmem>>, vector<16x128xf32>,
    return
  }
  func.func @transform_0(%arg0: i32) -> (i32, i32) {
    %c0_i32 = arith.constant 0 : i32
    %c0_i32_0 = arith.constant 0 : i32
    return %arg0, %c0_i32 : i32, i32
  }
  func.func @transform_1(%arg0: i32) -> (i32, i32) {
    %c0_i32 = arith.constant 0 : i32
    %c0_i32_0 = arith.constant 0 : i32
    %c0_i32_1 = arith.constant 0 : i32
    return %c0_i32, %c0_i32_0 : i32, i32
  }
  func.func @transform_2(%arg0: i32) -> (i32, i32) {
    %c0_i32 = arith.constant 0 : i32
    %c0_i32_0 = arith.constant 0 : i32
    %c0_i32_1 = arith.constant 0 : i32
    return %c0_i32, %c0_i32_0 : i32, i32
  }
  func.func @transform_3(%arg0: i32) -> (i32, i32) {
    %c0_i32 = arith.constant 0 : i32
    %c0_i32_0 = arith.constant 0 : i32
    %c0_i32_1 = arith.constant 0 : i32
    return %c0_i32, %c0_i32_0 : i32, i32
  }
  func.func @transform_4(%arg0: i32) -> (i32, i32) {
    %c0_i32 = arith.constant 0 : i32
    %c0_i32_0 = arith.constant 0 : i32
    %c0_i32_1 = arith.constant 0 : i32
    return %c0_i32, %c0_i32_0 : i32, i32
  }
  func.func @transform_5(%arg0: i32) -> (i32, i32) {
    %c0_i32 = arith.constant 0 : i32
    %c0_i32_0 = arith.constant 0 : i32
    return %arg0, %c0_i32 : i32, i32
  }
}

</mosaic_0001>

<bundles_post_ra>
// kernel: tpu_custom_call.1
= control target key start
LH: loop header
LB: loop body
LE: loop exit
PB: predicated region body
PF: predicated region fallthrough
CT: control target
= control target key end

     0   :  { %10 = vsyncpa [#allocation3], 0  ;;  %s571_s0 = inlined_call_operand.hbm [shape: f32[8,128], index: 0, kind: input, shape index: {}]   ;;  %s572_s1 = inlined_call_operand.hbm [shape: bf16[128,128], index: 1, kind: input, shape index: {}]   ;;  %s573_s2 = inlined_call_operand.vmem [shape: f32[1,128], index: 2, kind: input, shape index: {}]   ;;  %s574_s3 = inlined_call_operand.hbm [shape: bf16[128,128], index: 3, kind: input, shape index: {}]   ;;  %s575_s4 = inlined_call_operand.vmem [shape: f32[1,128], index: 4, kind: input, shape index: {}]   ;;  %s576_s5 = inlined_call_operand.hbm [shape: f32[8,128], index: 5, kind: output, shape index: {}]  }
   0x1   :  { %11 = vsyncpa [#allocation6], 0 }
   0x2   :  { %12 = vsyncpa [#allocation4], 0 }
   0x3   :  { %17 = vsyncadd [#allocation3], 128  ;;  %s501_s18 = smov [#allocation5]  }
   0x4   :  { %s30_s19 = sshll.u32 %s501_s18, 4  ;;  %s31_s19 = int_to_ptr.vmem [resolvable:$true] %s30_s19 }
   0x5   :  { %s423_s20 = scalar_lea.vmem %s31_s19, 1024  ;;  %p428_p1 = scmp.lt.s32.totalorder %s31_s19, %s31_s19 }
   0x6   :  { %p424_p0 = scmp.ne.s32.totalorder %s31_s19, %s423_s20  ;;  %p429_p2 = scmp.lt.s32.totalorder %s423_s20, %s423_s20 }
   0x8   :  { %p430_p3 = por %p429_p2, %p428_p1 }
   0xa   :  { %p431_p4 = pnand %p430_p3, %p424_p0 }
   0xc   :  { %434 = shalt.err (!%p431_p4)
}
   0xd   :  { %s502_s21 = smov 64   ;;  %s503_s22 = smov 4  }
   0xe   :  { %36 = dma.hbm_to_vmem [thread:$0]  %s572_s1, 1024, %s31_s19, [#allocation6], %s502_s21, %s502_s21, %s503_s22  }
   0xf   :  { %s504_s25 = smov [#allocation2]  }
  0x10   :  { %s18_s26 = sshll.u32 %s504_s25, 4  ;;  %s19_s26 = int_to_ptr.vmem [resolvable:$true] %s18_s26 }
  0x11   :  { %s443_s27 = scalar_lea.vmem %s19_s26, 128  ;;  %s447_s28 = scalar_lea.vmem %s19_s26, 256 }
  0x12   :  { %p444_p5 = scmp.ne.s32.totalorder %s19_s26, %s443_s27  ;;  %p448_p6 = scmp.lt.s32.totalorder %s19_s26, %s19_s26 }
  0x13   :  { %p449_p7 = scmp.lt.s32.totalorder %s447_s28, %s443_s27 }
  0x15   :  { %p450_p8 = por %p449_p7, %p448_p6 }
  0x17   :  { %p451_p9 = pnand %p450_p8, %p444_p5 }
  0x19   :  { %454 = shalt.err (!%p451_p9)
}
  0x1a   :  { %s505_s29 = smov 128   ;;  %s506_s30 = smov 8  }
  0x1b   :  { %24 = dma.hbm_to_vmem [thread:$0]  %s571_s0, 128, %s19_s26, [#allocation3], %s505_s29, %s505_s29, %s506_s30  }
  0x1c   :  { %s507_s1 = smov [#allocation7]  }
  0x1d   :  { %s44_s8 = sshll.u32 %s507_s1, 4  ;;  %s45_s8 = int_to_ptr.vmem [resolvable:$true] %s44_s8 }
  0x1e   :  { %s463_s9 = scalar_lea.vmem %s45_s8, 1024  ;;  %p468_p11 = scmp.lt.s32.totalorder %s45_s8, %s45_s8 }
  0x1f   :  { %p464_p10 = scmp.ne.s32.totalorder %s45_s8, %s463_s9  ;;  %p469_p12 = scmp.lt.s32.totalorder %s463_s9, %s463_s9 }
  0x21   :  { %p470_p13 = por %p469_p12, %p468_p11 }
  0x23   :  { %p471_p0 = pnand %p470_p13, %p464_p10 }
  0x25   :  { %474 = shalt.err (!%p471_p0)
}
  0x26   :  { %50 = dma.hbm_to_vmem [thread:$0]  %s574_s3, 1024, %s45_s8, [#allocation6], %s502_s21, %s502_s21, %s503_s22  }
  0x27   :  { %495 = dma.done.wait [#allocation3], 256  }
  0x28   :  { %496 = vsyncadd [#allocation3], 4294967040 }
  0x29   :  { %497 = dma.done.wait [#allocation6], 2048  }
  0x2a   :  { %498 = vsyncadd [#allocation6], 4294965248  ;;  %v508_v0 = vmov 0.0   ;;  %vm509_vm0 = vmmov 0   ;;  %v399_v1 = vld [vmem:[#allocation5 + $0x38] sm:$0xff]   ;;  %v400_v2 = vld [vmem:[#allocation5 + $0x30] sm:$0xff]  }
  0x2b   :  { %349 = vmatprep.subr.bf16.mxu0 %v508_v0  ;;  %365 = vmatprep.mubr.msk.bf16.mxu0 %vm509_vm0, %v508_v0  ;;  %v401_v3 = vld [vmem:[#allocation5 + $0x28] sm:$0xff]   ;;  %v407_v4 = vld [vmem:[#allocation7 + $0x38] sm:$0xff]   ;;  %v402_v5 = vld [vmem:[#allocation5 + $0x20] sm:$0xff]  }
  0x2c   :  { %369 = vmatprep.subr.bf16.mxu1 %v508_v0  ;;  %385 = vmatprep.mubr.msk.bf16.mxu1 %vm509_vm0, %v508_v0  ;;  %v408_v6 = vld [vmem:[#allocation7 + $0x30] sm:$0xff]   ;;  %v403_v7 = vld [vmem:[#allocation5 + $0x18] sm:$0xff]   ;;  %v409_v8 = vld [vmem:[#allocation7 + $0x28] sm:$0xff]  }
  0x2d   :  { %350 = vmatpush3.bf16.msra.mxu0 %v399_v1  ;;  %370 = vmatpush3.bf16.msra.mxu1 %v407_v4  ;;  %v404_v9 = vld [vmem:[#allocation5 + $0x10] sm:$0xff]   ;;  %v410_v10 = vld [vmem:[#allocation7 + $0x20] sm:$0xff]   ;;  %v405_v11 = vld [vmem:[#allocation5 + $0x8] sm:$0xff]  }
  0x2e   :  { %351 = vmatprep.subr.bf16.mxu0 %v508_v0  ;;  %371 = vmatprep.subr.bf16.mxu1 %v508_v0  ;;  %v411_v12 = vld [vmem:[#allocation7 + $0x18] sm:$0xff]   ;;  %v406_v13 = vld [vmem:[#allocation5] sm:$0xff]   ;;  %v63_v14 = vld [vmem:[#allocation2] sm:$0xff] }
  0x2f   :  { %v64_v15 = vld [vmem:[#allocation2 + $0x8] sm:$0xff]  ;;  %v412_v17 = vld [vmem:[#allocation7 + $0x10] sm:$0xff]   ;;  %v413_v18 = vld [vmem:[#allocation7 + $0x8] sm:$0xff]  }
  0x30   :  { %v65_v16 = vpack.c.bf16 %v64_v15, %v63_v14  ;;  %v414_v19 = vld [vmem:[#allocation7] sm:$0xff]   ;;  %v313_v20 = vld [vmem:[%s573_s2] ss:$0 sm:$0xff] }
  0x31   :  { %352 = vmatpush3.bf16.msra.mxu0 %v400_v2  ;;  %372 = vmatpush3.bf16.msra.mxu1 %v408_v6  ;;  %v322_v30 = vld [vmem:[%s575_s4] ss:$0 sm:$0xff] }
  0x32   :  { %353 = vmatprep.subr.bf16.mxu0 %v508_v0  ;;  %373 = vmatprep.subr.bf16.mxu1 %v508_v0 }
  0x35   :  { %354 = vmatpush3.bf16.msra.mxu0 %v401_v3  ;;  %374 = vmatpush3.bf16.msra.mxu1 %v409_v8 }
  0x36   :  { %355 = vmatprep.subr.bf16.mxu0 %v508_v0  ;;  %375 = vmatprep.subr.bf16.mxu1 %v508_v0 }
  0x39   :  { %356 = vmatpush3.bf16.msra.mxu0 %v402_v5  ;;  %376 = vmatpush3.bf16.msra.mxu1 %v410_v10 }
  0x3a   :  { %357 = vmatprep.subr.bf16.mxu0 %v508_v0  ;;  %377 = vmatprep.subr.bf16.mxu1 %v508_v0 }
  0x3d   :  { %358 = vmatpush3.bf16.msra.mxu0 %v403_v7  ;;  %378 = vmatpush3.bf16.msra.mxu1 %v411_v12 }
  0x3e   :  { %359 = vmatprep.subr.bf16.mxu0 %v508_v0  ;;  %379 = vmatprep.subr.bf16.mxu1 %v508_v0 }
  0x41   :  { %360 = vmatpush3.bf16.msra.mxu0 %v404_v9  ;;  %380 = vmatpush3.bf16.msra.mxu1 %v412_v17 }
  0x42   :  { %361 = vmatprep.subr.bf16.mxu0 %v508_v0  ;;  %381 = vmatprep.subr.bf16.mxu1 %v508_v0 }
  0x45   :  { %362 = vmatpush3.bf16.msra.mxu0 %v405_v11  ;;  %382 = vmatpush3.bf16.msra.mxu1 %v413_v18 }
  0x46   :  { %363 = vmatprep.subr.bf16.mxu0 %v508_v0  ;;  %383 = vmatprep.subr.bf16.mxu1 %v508_v0 }
  0x49   :  { %364 = vmatpush3.bf16.msra.mxu0 %v406_v13  ;;  %384 = vmatpush3.bf16.msra.mxu1 %v414_v19 }
  0x4c   :  { %366 = vmatmul.mubr.bf16.vlgmr.msra.gmra.mxu0 %v65_v16 }
 0x10c   :  { %v171_v21 = vpop.f32.mrf.mxu0 }
 0x10d   :  { %v172_v23 = vadd.f32 %v313_v20, %v171_v21 }
 0x10e   :  { %v367_v22 = vpop.f32.mrf.mxu0 }
 0x10f   :  { %v178_v27 = vmax.f32 %v172_v23, 0.0 }
 0x110   :  { %v174_v24 = vpop.f32.mrf.mxu0 }
 0x111   :  { %v175_v25 = vadd.f32 %v313_v20, %v174_v24 }
 0x112   :  { %v368_v26 = vpop.f32.mrf.mxu0 }
 0x113   :  { %v179_v28 = vmax.f32 %v175_v25, 0.0 }
 0x115   :  { %v180_v29 = vpack.c.bf16 %v179_v28, %v178_v27 }
 0x117   :  { %386 = vmatmul.mubr.bf16.vlgmr.msra.gmra.mxu1 %v180_v29 }
 0x1d7   :  { %v286_v31 = vpop.f32.mrf.mxu1 }
 0x1d8   :  { %v287_v32 = vadd.f32 %v322_v30, %v286_v31 }
 0x1d9   :  { %v387_v33 = vpop.f32.mrf.mxu1 }
 0x1da   :  { %293 = vst [vmem:[#allocation8] sm:$0xff] %v287_v32 }
 0x1db   :  { %v289_v34 = vpop.f32.mrf.mxu1 }
 0x1dc   :  { %v290_v35 = vadd.f32 %v322_v30, %v289_v34 }
 0x1dd   :  { %v388_v36 = vpop.f32.mrf.mxu1 }
 0x1de   :  { %294 = vst [vmem:[#allocation8 + $0x8] sm:$0xff] %v290_v35 }
 0x1df   :  { %299 = vsyncadd [#allocation4], 128  ;;  %s510_s2 = smov [#allocation8]  }
 0x1e0   :  { %s300_s14 = sshll.u32 %s510_s2, 4  ;;  %s301_s14 = int_to_ptr.vmem [resolvable:$true] %s300_s14 }
 0x1e1   :  { %s475_s15 = scalar_lea.vmem %s301_s14, 128  ;;  %s479_s16 = scalar_lea.vmem %s301_s14, 256 }
 0x1e2   :  { %p476_p1 = scmp.ne.s32.totalorder %s301_s14, %s475_s15  ;;  %p480_p2 = scmp.lt.s32.totalorder %s301_s14, %s301_s14 }
 0x1e3   :  { %p481_p3 = scmp.lt.s32.totalorder %s479_s16, %s475_s15 }
 0x1e5   :  { %p482_p4 = por %p481_p3, %p480_p2 }
 0x1e7   :  { %p483_p5 = pnand %p482_p4, %p476_p1 }
 0x1e9   :  { %486 = shalt.err (!%p483_p5)
}
 0x1ea   :  { %306 = dma.vmem_to_hbm [thread:$0]  %s301_s14, 128, %s576_s5, [#allocation4], %s505_s29, %s505_s29, %s506_s30  }
 0x1eb   :  { %499 = dma.done.wait [#allocation4], 256  }
 0x1ec   :  { %500 = vsyncadd [#allocation4], 4294967040 }
 0x1ed   :  { %310 = vsyncpa [#allocation3], 1 }
 0x1ee   :  { %311 = vsyncpa [#allocation6], 1 }
 0x1ef   :  { %312 = vsyncpa [#allocation4], 1 }

</bundles_post_ra>
